<compile_context>
chip_gen: v7x
topology: tpu7x:2x2x1
jax: 0.10.0
libtpu: 0.0.40
codegen_flags: <defaults>
</compile_context>

<pallas_src>
import functools

import jax
import jax.numpy as jnp
from jax.experimental import pallas as pl
from jax.experimental.pallas import tpu as pltpu


def _foo_kernel(param_ref, buf_ref, x_ref, o_ref, acc_ref, *, n_rows):
    # param_ref, buf_ref: (1,) scalars in SMEM
    # x_ref: (TN, TD) tile in VMEM; o_ref: (1, TD) in VMEM
    # acc_ref: (1, TD) f32 VMEM scratch accumulator
    k = pl.program_id(1)  # reduction (dim 0) axis, last grid axis

    @pl.when(k == 0)
    def _init():
        acc_ref[...] = jnp.zeros_like(acc_ref)

    # Per-tile partial reduction over dim 0. Scalars are hoisted out of the
    # per-element path: no p*x+b per element, only a sublane reduce per tile.
    acc_ref[...] += jnp.sum(x_ref[...].astype(jnp.float32), axis=0, keepdims=True)

    @pl.when(k == pl.num_programs(1) - 1)
    def _finalize():
        p = param_ref[0].astype(jnp.float32)
        b = buf_ref[0].astype(jnp.float32)
        # N*buf added exactly once (not per grid step) to match
        # (param * x + buf).sum(dim=0).
        o_ref[...] = (p * acc_ref[...] + jnp.float32(n_rows) * b).astype(o_ref.dtype)


def _pick_tile(dim, target, align):
    """Largest tile <= target that is a multiple of `align` and divides `dim`,
    falling back to the full dim (full-extent blocks are always legal)."""
    if dim <= target:
        return dim
    t = (target // align) * align
    while t >= align:
        if dim % t == 0:
            return t
        t -= align
    return dim


def foo_forward(param, buf, x, *, tn=None, td=None):
    """param: (1,), buf: (1,), x: (N, D) -> (D,)  ==  (param*x + buf).sum(0)."""
    n, d = x.shape
    # Default tile targets: lane-dense TD (multiple of 128), TN multiple of 8.
    # f32 (2048, 1024) tile = 8 MiB -> 16 MiB double-buffered, safe on v7x's
    # 64 MiB VMEM and comfortably under the scoped limit on v5e/v6e.
    if td is None:
        td = _pick_tile(d, 1024, 128)
    if tn is None:
        tn = _pick_tile(n, 2048, 8)

    out_dtype = jnp.promote_types(param.dtype, x.dtype)
    grid = (d // td, n // tn)  # reduction axis (N) last

    out = pl.pallas_call(
        functools.partial(_foo_kernel, n_rows=n),
        out_shape=jax.ShapeDtypeStruct((1, d), out_dtype),
        grid_spec=pltpu.PrefetchScalarGridSpec(
            num_scalar_prefetch=0,
            grid=grid,
            in_specs=[
                pl.BlockSpec(memory_space=pltpu.SMEM),          # param (1,)
                pl.BlockSpec(memory_space=pltpu.SMEM),          # buf   (1,)
                pl.BlockSpec((tn, td), lambda j, k: (k, j)),    # x tile
            ],
            out_specs=pl.BlockSpec((1, td), lambda j, k: (0, j)),  # accumulator-resident over k
            scratch_shapes=[pltpu.VMEM((1, td), jnp.float32)],
        ),
        compiler_params=pltpu.CompilerParams(
            dimension_semantics=("parallel", "arbitrary"),
            vmem_limit_bytes=64 * 1024 * 1024,
        ),
    )(param, buf, x)
    return jnp.reshape(out, (d,))  # squeeze outside the kernel (free in XLA)


if __name__ == "__main__":
    key = jax.random.PRNGKey(0)
    k_param, k_buf, k_x = jax.random.split(key, 3)

    # Deterministic "randn"-style parameter / buffer initialization.
    param = jax.random.normal(k_param, (1,), dtype=jnp.float32)
    buf = jax.random.normal(k_buf, (1,), dtype=jnp.float32)

    # Small input: N=256 rows (reduced dim 0), D=512 features (lane dim).
    N, D = 256, 512
    x = jax.random.normal(k_x, (N, D), dtype=jnp.float32)

    # Use small explicit tiles here so the multi-step accumulator path
    # (grid = (2, 4)) is exercised even at test-sized shapes.
    out = foo_forward(param, buf, x, tn=64, td=256)
    jax.block_until_ready(out)

    # Sanity check against plain-JAX reference.
    ref = (param * x + buf).sum(axis=0)
    assert out.shape == (D,)
    assert jnp.allclose(out, ref, atol=1e-4, rtol=1e-5)

    print("KERNEL_OK")
</pallas_src>

<mosaic_0001>
module attributes {stable_mosaic.version = 11 : i64} {
  func.func @_foo_kernel(%arg0: i32, %arg1: i32, %arg2: memref<1xf32, #tpu.memory_space<smem>>, %arg3: memref<1xf32, #tpu.memory_space<smem>>, %arg4: memref<64x256xf32, #tpu.memory_space<vmem>>, %arg5: memref<1x256xf32, #tpu.memory_space<vmem>>, %arg6: memref<1x256xf32, #tpu.memory_space<vmem>>) attributes {dimension_semantics = [#tpu.dimension_semantics<parallel>, #tpu.dimension_semantics<arbitrary>], iteration_bounds = array<i64: 2, 4>, scalar_prefetch = 0 : i64, scratch_operands = 1 : i64, tpu.core_type = #tpu.core_type<tc>, window_params = [{transform_indices = @transform_0, window_bounds = array<i64: 1>}, {transform_indices = @transform_1, window_bounds = array<i64: 1>}, {transform_indices = @transform_2, window_bounds = array<i64: 64, 256>}, {transform_indices = @transform_3, window_bounds = array<i64: 1, 256>}]} {
    %c0_i32 = arith.constant 0 : i32
    %0 = arith.cmpi eq, %arg1, %c0_i32 : i32
    %1 = arith.extui %0 : i1 to i32
    %c0_i32_0 = arith.constant 0 : i32
    %2 = arith.cmpi ne, %1, %c0_i32_0 : i32
    scf.if %2 {
      %cst_7 = arith.constant 0.000000e+00 : f32
      %12 = vector.broadcast %cst_7 : f32 to vector<1x256xf32>
      %c0_8 = arith.constant 0 : index
      %c0_9 = arith.constant 0 : index
      %13 = vector.load %arg6[%c0_8, %c0_9] : memref<1x256xf32, #tpu.memory_space<vmem>>, vector<1x256xf32>
      tpu.vector_store %arg6[%c0_8, %c0_9], %12 {strides = array<i32>} : memref<1x256xf32, #tpu.memory_space<vmem>>, vector<1x256xf32>,
    } else {
    }
    %c0 = arith.constant 0 : index
    %c0_1 = arith.constant 0 : index
    %3 = vector.load %arg6[%c0, %c0_1] : memref<1x256xf32, #tpu.memory_space<vmem>>, vector<1x256xf32>
    %c0_2 = arith.constant 0 : index
    %c0_3 = arith.constant 0 : index
    %4 = vector.load %arg4[%c0_2, %c0_3] : memref<64x256xf32, #tpu.memory_space<vmem>>, vector<64x256xf32>
    %cst = arith.constant dense<0.000000e+00> : vector<256xf32>
    %5 = vector.multi_reduction <add>, %4, %cst [0] : vector<64x256xf32> to vector<256xf32>
    %6 = vector.shape_cast %5 : vector<256xf32> to vector<1x256xf32>
    %7 = arith.addf %3, %6 : vector<1x256xf32>
    %c0_4 = arith.constant 0 : index
    %c0_5 = arith.constant 0 : index
    %8 = vector.load %arg6[%c0_4, %c0_5] : memref<1x256xf32, #tpu.memory_space<vmem>>, vector<1x256xf32>
    tpu.vector_store %arg6[%c0_4, %c0_5], %7 {strides = array<i32>} : memref<1x256xf32, #tpu.memory_space<vmem>>, vector<1x256xf32>,
    %c3_i32 = arith.constant 3 : i32
    %9 = arith.cmpi eq, %arg1, %c3_i32 : i32
    %10 = arith.extui %9 : i1 to i32
    %c0_i32_6 = arith.constant 0 : i32
    %11 = arith.cmpi ne, %10, %c0_i32_6 : i32
    scf.if %11 {
      %c0_7 = arith.constant 0 : index
      %12 = memref.load %arg2[%c0_7] : memref<1xf32, #tpu.memory_space<smem>>
      %c0_8 = arith.constant 0 : index
      %13 = memref.load %arg3[%c0_8] : memref<1xf32, #tpu.memory_space<smem>>
      %c0_9 = arith.constant 0 : index
      %c0_10 = arith.constant 0 : index
      %14 = vector.load %arg6[%c0_9, %c0_10] : memref<1x256xf32, #tpu.memory_space<vmem>>, vector<1x256xf32>
      %15 = vector.broadcast %12 : f32 to vector<1x256xf32>
      %16 = arith.mulf %15, %14 : vector<1x256xf32>
      %cst_11 = arith.constant 2.560000e+02 : f32
      %17 = arith.mulf %cst_11, %13 : f32
      %18 = vector.broadcast %17 : f32 to vector<1x256xf32>
      %19 = arith.addf %16, %18 : vector<1x256xf32>
      %c0_12 = arith.constant 0 : index
      %c0_13 = arith.constant 0 : index
      %20 = vector.load %arg5[%c0_12, %c0_13] : memref<1x256xf32, #tpu.memory_space<vmem>>, vector<1x256xf32>
      tpu.vector_store %arg5[%c0_12, %c0_13], %19 {strides = array<i32>} : memref<1x256xf32, #tpu.memory_space<vmem>>, vector<1x256xf32>,
    } else {
    }
    return
  }
  func.func @transform_0(%arg0: i32, %arg1: i32) -> i32 {
    %c0_i32 = arith.constant 0 : i32
    %c0_i32_0 = arith.constant 0 : i32
    return %c0_i32 : i32
  }
  func.func @transform_1(%arg0: i32, %arg1: i32) -> i32 {
    %c0_i32 = arith.constant 0 : i32
    %c0_i32_0 = arith.constant 0 : i32
    return %c0_i32 : i32
  }
  func.func @transform_2(%arg0: i32, %arg1: i32) -> (i32, i32) {
    %c0_i32 = arith.constant 0 : i32
    return %arg1, %arg0 : i32, i32
  }
  func.func @transform_3(%arg0: i32, %arg1: i32) -> (i32, i32) {
    %c0_i32 = arith.constant 0 : i32
    %c0_i32_0 = arith.constant 0 : i32
    return %c0_i32, %arg0 : i32, i32
  }
}

</mosaic_0001>

<bundles_post_ra>
// kernel: tpu_custom_call.1
= control target key start
LH: loop header
LB: loop body
LE: loop exit
PB: predicated region body
PF: predicated region fallthrough
CT: control target
= control target key end

     0   :  { %s958_s0 = inlined_call_operand.<no memory space> [shape: f32[1], index: 0, kind: input, shape index: {}]   ;;  %s959_s1 = inlined_call_operand.<no memory space> [shape: f32[1], index: 1, kind: input, shape index: {}]   ;;  %s960_s2 = inlined_call_operand.hbm [shape: f32[256,512], index: 2, kind: input, shape index: {}]   ;;  %s961_s3 = inlined_call_operand.hbm [shape: f32[1,512], index: 3, kind: output, shape index: {}]  }
   0x1   :  { %8 = sst [smem:[#allocation3]] %s958_s0 }
   0x2   :  { %9 = sst [smem:[#allocation4]] %s959_s1 }
   0x3   :  { %10 = vsyncpa [#allocation6], 0 }
   0x4   :  { %12 = vsyncpa [#allocation6 + $0x1], 0 }
   0x5   :  { %13 = vsyncpa [#allocation7], 0 }
   0x6   :  { %15 = vsyncpa [#allocation7 + $0x1], 0  ;;  %s714_s16 = smov 0   ;;  %s716_s17 = smov 0  }
   0x7   :  { %s718_s18 = smov 0   ;;  %s720_s19 = smov 0  }
   0x8   :  { %s722_s20 = smov 0   ;;  %s724_s21 = smov 0  }
   0x9   :  { %s726_s0 = smov 0   ;;  %s728_s22 = smov 0  }
   0xa   :  { %s730_s1 = smov 0   ;;  %s732_s23 = smov 0  }
   0xb   :  { %s734_s24 = smov 0  }
   0xc LB: > { %s399_s25 = sadd.s32 4294967295, %s679_s24   ;;  %s400_s26 = sadd.s32 4294967294, %s679_s24   ;;  %s679_s24 = sphi %s734_s24, %s21_s24   ;;  %s675_s23 = sphi %s732_s23, %s983_s23   ;;  %s671_s1 = sphi %s730_s1, %s982_s1   ;;  %s667_s22 = sphi %s728_s22, %s981_s22   ;;  %s663_s0 = sphi %s726_s0, %s980_s0   ;;  %s659_s21 = sphi %s724_s21, %s979_s21   ;;  %s655_s20 = sphi %s722_s20, %s978_s20   ;;  %s651_s19 = sphi %s720_s19, %s977_s19   ;;  %s647_s18 = sphi %s718_s18, %s976_s18   ;;  %s643_s17 = sphi %s716_s17, %s975_s17   ;;  %s639_s16 = sphi %s714_s16, %s974_s16  }
   0xd   : > { %s30_s27 = sadd.s32 1, %s671_s1  ;;  %s33_s28 = sadd.s32 1, %s675_s23 }
   0xe   : > { %p31_p0 = scmp.ge.s32.totalorder %s30_s27, 4  ;;  %s84_s29 = sadd.s32 1, %s659_s21 }
   0xf   : > { %p91_p1 = scmp.ne.s32.totalorder %s659_s21, %s655_s20  ;;  %p92_p2 = scmp.eq.s32.totalorder %s679_s24, 0 }
  0x10   : > { %s985_s27 = smov (%p31_p0, %s30_s27), 0  ;;  %s987_s28 = smov (!%p31_p0, %s33_s28), %s675_s23 }
  0x11   : > { %s79_s30 = ssub.s32 %s671_s1, %s985_s27  ;;  %p780_p3 = por %p92_p2, %p91_p1 }
  0x12   : > { %p35_p4 = scmp.ge.s32.totalorder %s987_s28, 2  ;;  %p97_p5 = scmp.ne.s32.totalorder %s655_s20, %s651_s19 }
  0x13   : > { %p98_p6 = scmp.eq.s32.totalorder %s399_s25, 0  ;;  %s110_s5 = sadd.s32 1, %s647_s18 }
  0x14   : > { %s989_s28 = smov (%p35_p4, %s987_s28), 0  ;;  %p120_p8 = scmp.ne.s32.totalorder %s647_s18, %s643_s17 }
  0x15   : > { %965 = sst [smem:[#allocation11_spill]] %s989_s28  ;;  %p788_p7 = por %p98_p6, %p97_p5 }
  0x16   : > { %s80_s7 = ssub.s32 %s675_s23, %s989_s28  ;;  %p121_p9 = scmp.eq.s32.totalorder %s399_s25, 7 }
  0x17   : > { %s81_s8 = sor.u32 %s80_s7, %s79_s30  ;;  %p108_p10 = scmp.eq.s32.totalorder %s80_s7, 0 }
  0x18   : > { %p82_p11 = scmp.eq.s32.totalorder %s81_s8, 0  ;;  %p796_p12 = por %p121_p9, %p120_p8 }
  0x19   : > { %s801_s10 = scalar_select %p108_p10, %s647_s18, %s110_s5  }
  0x1a   : > { %s967_s9 = scalar_select %p796_p12, 1, 0 }
  0x1b   : > { %s804_s11 = scalar_select %p82_p11, %s659_s21, %s84_s29  }
  0x1c   : > { %p126_p13 = scmp.ne.s32.totalorder %s643_s17, %s639_s16  ;;  %p127_p0 = scmp.eq.s32.totalorder %s400_s26, 7 }
  0x1d   : > { %p432_p1 = scmp.lt.s32.totalorder %s679_s24, 8  ;;  %s153_s13 = sand.u32 1, %s659_s21  }
  0x1e   : > { %p809_p2 = por %p127_p0, %p126_p13  ;;  %s403_s14 = sshll.u32 %s153_s13, 7 }
  0x1f   : > { %s405_s15 = sshll.u32 %s675_s23, 1  ;;  %s418_s19 = sshll.u32 %s671_s1, 5 }
  0x20   : > { %s968_s12 = scalar_select %p809_p2, 1, 0 }
  0x21   : > { %s157_s25 = scalar_lea.vmem [#allocation5], %s403_s14  ;;  %s164_s7 = sadd.s32 %s418_s19, %s405_s15 }
  0x22   : > { %s167_s30 = sshll.u32 %s157_s25, 4  ;;  %s407_s5 = sshll.u32 %s164_s7, 7  ;;  %s816_s30 = int_to_ptr.vmem [resolvable:$true] %s167_s30 }
  0x23   : > { %p820_p4 = pnand %p432_p1, %p780_p3  ;;  %s827_s28 = scalar_lea.hbm %s960_s2, %s407_s5 }
  0x24   : > { %s830_s14 = scalar_lea.sflag [#allocation6], %s153_s13  ;;  %s527_s15 = scalar_lea.hbm %s827_s28, 2048 }
  0x25   : > { %p528_p6 = scmp.ne.s32.totalorder %s827_s28, %s527_s15  ;;  %p529_p3 = pneg %p820_p4 }
  0x26   : > { %s532_s25 = scalar_lea.hbm %s960_s2, 16384  ;;  %p533_p10 = scmp.lt.u32.totalorder %s827_s28, %s960_s2 }
  0x27   : > { %p530_p8 = pnand %p529_p3, %p528_p6  ;;  %p534_p11 = scmp.lt.u32.totalorder %s532_s25, %s527_s15 }
  0x28   : > { %p536_p0 = scmp.lt.u32.totalorder %s527_s15, %s827_s28 }
  0x29   : > { %p531_p9 = pneg %p530_p8  ;;  %p535_p13 = por %p534_p11, %p533_p10 }
  0x2b   : > { %p537_p1 = por %p536_p0, %p535_p13 }
  0x2d   : > { %p538_p5 = pnand %p537_p1, %p531_p9 }
  0x2f   : > { %541 = shalt.err (!%p538_p5)
}
  0x30   : > { %s542_s13 = scalar_lea.vmem %s816_s30, 2048  ;;  %s681_s26 = smov [#allocation5]  }
  0x31   : > { %p543_p6 = scmp.ne.s32.totalorder %s816_s30, %s542_s13  ;;  %s547_s8 = sshll.u32 %s681_s26, 4  ;;  %s548_s8 = int_to_ptr.vmem [resolvable:$false] %s547_s8 }
  0x32   : > { %s549_s4 = scalar_lea.vmem %s548_s8, 4096  ;;  %p550_p12 = scmp.lt.s32.totalorder %s816_s30, %s548_s8 }
  0x33   : > { %p545_p8 = pnand %p543_p6, %p529_p3  ;;  %p551_p10 = scmp.lt.s32.totalorder %s549_s4, %s542_s13 }
  0x35   : > { %p546_p2 = pneg %p545_p8  ;;  %p552_p11 = por %p551_p10, %p550_p12 }
  0x37   : > { %p553_p13 = pnand %p552_p11, %p546_p2 }
  0x39   : > { %556 = shalt.err (!%p553_p13)
}
  0x3a   : > { %s682_s15 = smov 512   ;;  %s683_s19 = smov 256  }
  0x3b   : > { %s684_s25 = smov 16   ;;  %p175_p5 = scmp.lt.s32.totalorder %s679_s24, 9 }
  0x3c   : > { %427 = dma.hbm_to_vmem [thread:$0]  (!%p820_p4), %s827_s28, 2048, %s816_s30, %s830_s14, %s682_s15, %s683_s19, %s684_s25  }
  0x3d   : > { %p970_p3 = scmp.ge.s32.totalorder %s679_s24, 1 }
  0x3f   : > { %p176_p9 = pnand %p970_p3, %p175_p5 }
  0x40   : > { %s181_s7 = sand.u32 (!%p176_p9), 1, %s655_s20  }
  0x41   : > { %179 = sbr.rel (%p176_p9) target bundleno = 156 (0x9c), region = 32  ;;  %s409_s5 = sshll.u32 (!%p176_p9), %s181_s7, 7 }
  0x42   : > { %s182_s13 = scalar_lea.sflag (!%p176_p9), [#allocation6], %s181_s7  ;;  %s862_s26 = scalar_lea.vmem (!%p176_p9), [#allocation5], %s409_s5 }
  0x48   : > { %630 = dma.done.wait (%p788_p7), %s182_s13, 2048  }
  0x49   : > { %632 = vsyncadd (%p788_p7), %s182_s13, 4294965248  ;;  %s205_s29 = sand.u32 1, %s643_s17   ;;  %p411_p12 = scmp.ne.s32.totalorder %s663_s0, 0 }
  0x4a   : > { %s871_s28 = sshll.u32 %s205_s29, 1  ;;  %v215_v0 = vlaneseq (!%p411_p12)  ;;  %v685_v1 = vmov (!%p411_p12), 0.0  }
  0x4b   : > { %s207_s30 = scalar_lea.vmem [#allocation8], %s871_s28  ;;  %214 = sbr.rel (%p411_p12) target bundleno = 82 (0x52), region = 40 }
  0x4c   : > { %vm217_vm0 = vcmp.lt.s32.totalorder (!%p411_p12), %v215_v0, 256 }
  0x4d   : > { %219 = vst.msk [vmem:[#allocation2] sm:$0x3] (!%p411_p12), %vm217_vm0, %v685_v1 }
  0x52 PF: > { %v221_v2 = vld [vmem:[%s862_s26] sm:$0xff]  ;;  %v222_v3 = vld [vmem:[%s862_s26 + $0x8] sm:$0xff]  ;;  %v223_v4 = vld [vmem:[%s862_s26 + $0x10] sm:$0xff]  ;;  %v686_v36 = vmov 1966171168   ;;  %v269_v38 = vlaneseq  ;;  %p412_p7 = scmp.ne.s32.totalorder %s663_s0, 3 }
  0x53   : > { %v224_v5 = vld [vmem:[%s862_s26 + $0x18] sm:$0xff]  ;;  %v225_v6 = vld [vmem:[%s862_s26 + $0x20] sm:$0xff]  ;;  %v226_v7 = vld [vmem:[%s862_s26 + $0x28] sm:$0xff]  ;;  %v237_v8 = vadd.f32 %v223_v4, %v221_v2  ;;  %v267_v37 = vunpack.c.l.s4 %v686_v36  ;;  %s291_s6 = sld [smem:[#allocation3]] (!%p412_p7) }
  0x54   : > { %v250_v9 = vadd.f32 %v224_v5, %v222_v3  ;;  %v227_v10 = vld [vmem:[%s862_s26 + $0x30] sm:$0xff]  ;;  %v228_v11 = vld [vmem:[%s862_s26 + $0x38] sm:$0xff]  ;;  %v229_v14 = vld [vmem:[%s862_s26 + $0x40] sm:$0xff]  ;;  %v270_v44 = vshrl.u32 %v269_v38, 7  ;;  %vm284_vm1 = vcmp.lt.s32.totalorder %v269_v38, 256  ;;  %s292_s14 = sld [smem:[#allocation4]] (!%p412_p7) }
  0x55   : > { %v238_v12 = vadd.f32 %v237_v8, %v225_v6  ;;  %v230_v15 = vld [vmem:[%s862_s26 + $0x48] sm:$0xff]  ;;  %v231_v18 = vld [vmem:[%s862_s26 + $0x50] sm:$0xff]  ;;  %v232_v19 = vld [vmem:[%s862_s26 + $0x58] sm:$0xff]  ;;  %v268_v43 = vunpack.c.0.s8 %v267_v37 }
  0x56   : > { %v251_v13 = vadd.f32 %v250_v9, %v226_v7  ;;  %v233_v22 = vld [vmem:[%s862_s26 + $0x60] sm:$0xff]  ;;  %v234_v23 = vld [vmem:[%s862_s26 + $0x68] sm:$0xff]  ;;  %v235_v26 = vld [vmem:[%s862_s26 + $0x70] sm:$0xff] }
  0x57   : > { %v239_v16 = vadd.f32 %v238_v12, %v227_v10  ;;  %v236_v27 = vld [vmem:[%s862_s26 + $0x78] sm:$0xff]  ;;  %v271_v49 = vsub.s32 %v268_v43, %v270_v44 }
  0x58   : > { %v252_v17 = vadd.f32 %v251_v13, %v228_v11  ;;  %v220_v52 = vld [vmem:[#allocation2] sm:$0x3] }
  0x59   : > { %v240_v20 = vadd.f32 %v239_v16, %v229_v14  ;;  %v294_v56 = vstv (!%p412_p7), %s291_s6 }
  0x5a   : > { %v253_v21 = vadd.f32 %v252_v17, %v230_v15  ;;  %s296_s8 = smul.f32 (!%p412_p7), 256.0, %s292_s14 }
  0x5b   : > { %v241_v24 = vadd.f32 %v240_v20, %v231_v18 }
  0x5c   : > { %v254_v25 = vadd.f32 %v253_v21, %v232_v19  ;;  %v297_v58 = vstv (!%p412_p7), %s296_s8 }
  0x5d   : > { %v242_v28 = vadd.f32 %v241_v24, %v233_v22 }
  0x5e   : > { %v255_v29 = vadd.f32 %v254_v25, %v234_v23 }
  0x5f   : > { %v243_v30 = vadd.f32 %v242_v28, %v235_v26 }
  0x60   : > { %v256_v31 = vadd.f32 %v255_v29, %v236_v27 }
  0x61   : > { %v244_v32 = vrot.slane %v243_v30, 4 }
  0x62   : > { %v257_v33 = vrot.slane %v256_v31, 4 }
  0x63   : > { %v245_v34 = vadd.f32 %v244_v32, %v243_v30 }
  0x64   : > { %v258_v35 = vadd.f32 %v257_v33, %v256_v31 }
  0x65   : > { %v246_v39 = vrot.slane %v245_v34, 2 }
  0x66   : > { %v259_v40 = vrot.slane %v258_v35, 2 }
  0x67   : > { %v247_v41 = vadd.f32 %v246_v39, %v245_v34 }
  0x68   : > { %v260_v42 = vadd.f32 %v259_v40, %v258_v35 }
  0x69   : > { %v248_v45 = vrot.slane %v247_v41, 1 }
  0x6a   : > { %v261_v46 = vrot.slane %v260_v42, 1 }
  0x6b   : > { %v249_v47 = vadd.f32 %v248_v45, %v247_v41 }
  0x6c   : > { %v262_v48 = vadd.f32 %v261_v46, %v260_v42 }
  0x6e   : > { %v265_v50 = vcombine.low %v249_v47, %v262_v48 }
  0x70   : > { %v272_v51 = vrot.slane %v265_v50, %v271_v49  ;;  %290 = sbr.rel (%p412_p7) target bundleno = 131 (0x83), region = 44 }
  0x72   : > { %v279_v53 = vrot.slane %v272_v51, %v271_v49 }
  0x74   : > { %v281_v54 = vadd.f32 %v279_v53, %v220_v52 }
  0x76   : > { %286 = vst.msk [vmem:[#allocation2] sm:$0x3] %vm284_vm1, %v281_v54 }
  0x7d   : > { %v293_v55 = vld [vmem:[#allocation2] sm:$0x3] }
  0x7e   : > { %v295_v57 = vmul.f32 %v294_v56, %v293_v55 }
  0x80   : > { %v298_v59 = vadd.f32 %v297_v58, %v295_v57 }
  0x82   : > { %299 = vst.msk [vmem:[%s207_s30] sm:$0x3] %vm284_vm1, %v298_v59 }
  0x83 PF: > { %s419_s4 = sshll.u32 %s667_s22, 5  ;;  %s315_s25 = sshll.u32 %s207_s30, 4  ;;  %s316_s25 = int_to_ptr.vmem [resolvable:$true] %s315_s25 }
  0x84   : > { %s898_s19 = scalar_lea.hbm %s961_s3, %s419_s4  ;;  %s301_s7 = scalar_lea.sflag [#allocation7], %s205_s29 }
  0x85   : > { %s557_s5 = scalar_lea.vmem %s316_s25, 32  ;;  %p971_p4 = scmp.ne.s32.totalorder %s967_s9, 0 }
  0x86   : > { %p558_p2 = scmp.ne.s32.totalorder %s316_s25, %s557_s5  ;;  %s687_s13 = smov [#allocation8]  }
  0x87   : > { %s561_s26 = sshll.u32 %s687_s13, 4  ;;  %s562_s26 = int_to_ptr.vmem [resolvable:$false] %s561_s26 }
  0x88   : > { %p559_p0 = pnand %p558_p2, %p971_p4  ;;  %s563_s6 = scalar_lea.vmem %s562_s26, 64 }
  0x89   : > { %p564_p6 = scmp.lt.s32.totalorder %s316_s25, %s562_s26  ;;  %p565_p8 = scmp.lt.s32.totalorder %s563_s6, %s557_s5 }
  0x8a   : > { %p560_p1 = pneg %p559_p0 }
  0x8b   : > { %p566_p10 = por %p565_p8, %p564_p6 }
  0x8d   : > { %p567_p11 = pnand %p566_p10, %p560_p1 }
  0x8f   : > { %570 = shalt.err (!%p567_p11)
}
  0x90   : > { %s571_s22 = scalar_lea.hbm %s898_s19, 32  ;;  %s575_s30 = scalar_lea.hbm %s961_s3, 64 }
  0x91   : > { %p572_p13 = scmp.ne.s32.totalorder %s898_s19, %s571_s22  ;;  %p576_p9 = scmp.lt.u32.totalorder %s898_s19, %s961_s3 }
  0x92   : > { %p577_p12 = scmp.lt.u32.totalorder %s575_s30, %s571_s22  ;;  %p579_p2 = scmp.lt.u32.totalorder %s571_s22, %s898_s19 }
  0x93   : > { %p573_p5 = pnand %p572_p13, %p971_p4 }
  0x94   : > { %p578_p7 = por %p577_p12, %p576_p9 }
  0x95   : > { %p574_p3 = pneg %p573_p5 }
  0x96   : > { %p580_p0 = por %p579_p2, %p578_p7 }
  0x98   : > { %p581_p1 = pnand %p580_p0, %p574_p3 }
  0x9a   : > { %584 = shalt.err (!%p581_p1)
}
  0x9b   : > { %422 = dma.vmem_to_hbm [thread:$0]  (%p971_p4), %s316_s25, 32, %s898_s19, %s301_s7  }
  0x9c PF: > { %p433_p6 = scmp.ge.s32.totalorder %s679_s24, 2  ;;  %s327_s4 = sand.u32 1, %s639_s16  }
  0x9d   : > { %p972_p8 = scmp.ne.s32.totalorder %s968_s12, 0  ;;  %s328_s15 = scalar_lea.sflag [#allocation7], %s327_s4 }
  0x9f   : > { %p429_p10 = pnand %p433_p6, %p972_p8 }
  0xa1   : > { %634 = dma.done.wait (!%p429_p10), %s328_s15, 32  }
  0xa2   : > { %636 = vsyncadd (!%p429_p10), %s328_s15, 4294967264  ;;  %s21_s24 = sadd.s32 1, %s679_s24   ;;  %s973_s9 = sld [smem:[#allocation11_spill]] }
  0xa3   : > { %p18_p11 = scmp.ge.s32.totalorder %s21_s24, 10   ;;  %s974_s16 = smov %s643_s17 }
  0xa4   : > { %s975_s17 = smov %s647_s18  ;;  %s976_s18 = smov %s801_s10 }
  0xa5   : > { %s977_s19 = smov %s655_s20  ;;  %s978_s20 = smov %s659_s21 }
  0xa6   : > { %s979_s21 = smov %s804_s11  ;;  %s980_s0 = smov %s671_s1 }
  0xa7   : > { %s981_s22 = smov %s675_s23  ;;  %s982_s1 = smov %s985_s27 }
  0xa8   : > { %s983_s23 = smov %s973_s9  ;;  %20 = sbr.rel (!%p18_p11) target bundleno = 12 (0xc), region = 85 }
  0xaf   :  { %333 = vsyncpa [#allocation6], 1 }
  0xb0   :  { %335 = vsyncpa [#allocation6 + $0x1], 1 }
  0xb1   :  { %336 = vsyncpa [#allocation7], 1 }
  0xb2   :  { %338 = vsyncpa [#allocation7 + $0x1], 1 }

</bundles_post_ra>
